<compile_context>
chip_gen: v7x
topology: tpu7x:2x2x1
jax: 0.10.0
libtpu: 0.0.40
codegen_flags: <defaults>
</compile_context>

<pallas_src>
import functools
import math

import jax
import jax.numpy as jnp
from jax.experimental import pallas as pl
from jax.experimental.pallas import tpu as pltpu


# ----------------------------- helpers -------------------------------------

def _fit(dim, want):
    """Pick a tile size <= want that divides dim (falls back to full dim)."""
    t = min(want, dim)
    return t if dim % t == 0 else dim


# ----------------------------- Pallas kernels -------------------------------

def _linear_kernel(x_ref, w_ref, b_ref, o_ref, acc_ref, *, activation,
                   w_transposed):
    # grid = (M/tm, N/tn, K/tk); K is the reduction axis (last, "arbitrary").
    @pl.when(pl.program_id(2) == 0)
    def _():
        acc_ref[...] = jnp.zeros_like(acc_ref)

    x = x_ref[...].astype(jnp.bfloat16)
    w = w_ref[...].astype(jnp.bfloat16)
    if w_transposed:
        # w tile is (tn, tk); contract both over their K axis (no HBM W^T copy).
        acc_ref[...] += jax.lax.dot_general(
            x, w, (((1,), (1,)), ((), ())), preferred_element_type=jnp.float32)
    else:
        acc_ref[...] += jnp.dot(x, w, preferred_element_type=jnp.float32)

    @pl.when(pl.program_id(2) == pl.num_programs(2) - 1)
    def _():
        y = acc_ref[...] + b_ref[...].astype(jnp.float32)
        if activation == "relu":
            y = jnp.maximum(y, 0.0)
        o_ref[...] = y.astype(o_ref.dtype)


def _ffn_kernel(x_ref, w1_ref, b1_ref, w2_ref, b2_ref, o_ref, acc_ref):
    # grid = (M/tm, F/tf); the (tm, tf) hidden activation lives only in VMEM.
    @pl.when(pl.program_id(1) == 0)
    def _():
        acc_ref[...] = jnp.zeros_like(acc_ref)

    x = x_ref[...].astype(jnp.bfloat16)
    h = jnp.dot(x, w1_ref[...].astype(jnp.bfloat16),
                preferred_element_type=jnp.float32)
    h = jnp.maximum(h + b1_ref[...].astype(jnp.float32), 0.0)   # f32 elementwise
    acc_ref[...] += jnp.dot(h.astype(jnp.bfloat16),
                            w2_ref[...].astype(jnp.bfloat16),
                            preferred_element_type=jnp.float32)

    @pl.when(pl.program_id(1) == pl.num_programs(1) - 1)
    def _():
        o_ref[...] = (acc_ref[...] + b2_ref[...].astype(jnp.float32)
                      ).astype(o_ref.dtype)


def _layernorm_kernel(x_ref, g_ref, b_ref, o_ref):
    x = x_ref[...].astype(jnp.float32)
    mean = jnp.mean(x, axis=-1, keepdims=True)
    var = jnp.mean((x - mean) ** 2, axis=-1, keepdims=True)
    inv = jax.lax.rsqrt(var + 1e-5)
    o_ref[...] = ((x - mean) * inv * g_ref[...] + b_ref[...]).astype(o_ref.dtype)


def _flash_attn_kernel(q_ref, k_ref, v_ref, o_ref, m_sc, l_sc, acc_sc, *,
                       sm_scale):
    # grid = (B*H, S/tq, S/tk); kv axis is the online-softmax reduction.
    qi = pl.program_id(1)
    ki = pl.program_id(2)
    tq = q_ref.shape[1]
    tk = k_ref.shape[1]
    q_start = qi * tq
    k_start = ki * tk

    @pl.when(ki == 0)
    def _():
        m_sc[...] = jnp.full_like(m_sc, -jnp.inf)
        l_sc[...] = jnp.zeros_like(l_sc)
        acc_sc[...] = jnp.zeros_like(acc_sc)

    # Skip kv blocks that are entirely above the causal diagonal.
    @pl.when(k_start <= q_start + tq - 1)
    def _():
        # scale folded into q: scales (tq, Dk) instead of (tq, tk)
        q = (q_ref[0] * sm_scale).astype(jnp.bfloat16)           # (tq, Dk)
        k = k_ref[0].astype(jnp.bfloat16)                        # (tk, Dk)
        s = jax.lax.dot_general(q, k, (((1,), (1,)), ((), ())),
                                preferred_element_type=jnp.float32)  # (tq, tk)
        # causal mask from index arithmetic (no (S,S) mask DMA)
        row = q_start + jax.lax.broadcasted_iota(jnp.int32, (tq, tk), 0)
        col = k_start + jax.lax.broadcasted_iota(jnp.int32, (tq, tk), 1)
        s = jnp.where(row >= col, s, jnp.float32(-1e9))

        m_prev = m_sc[...]
        m_new = jnp.maximum(m_prev, jnp.max(s, axis=-1, keepdims=True))
        alpha = jnp.exp(m_prev - m_new)
        p = jnp.exp(s - m_new)
        l_sc[...] = alpha * l_sc[...] + jnp.sum(p, axis=-1, keepdims=True)
        acc_sc[...] = alpha * acc_sc[...] + jnp.dot(
            p.astype(jnp.bfloat16), v_ref[0].astype(jnp.bfloat16),
            preferred_element_type=jnp.float32)
        m_sc[...] = m_new

    @pl.when(ki == pl.num_programs(2) - 1)
    def _():
        out = acc_sc[...] * pl.reciprocal(l_sc[...], approx=True)
        o_ref[...] = out[None].astype(o_ref.dtype)


# ----------------------------- wrappers -------------------------------------

def linear(x, w, b, *, activation=None, w_transposed=False,
           tm=256, tn=256, tk=512):
    """y = x @ w + b (or x @ w.T + b if w_transposed). bf16 MXU, f32 acc."""
    M, K = x.shape
    N = w.shape[0] if w_transposed else w.shape[1]
    tm, tn, tk = _fit(M, tm), _fit(N, tn), _fit(K, tk)
    grid = (M // tm, N // tn, K // tk)

    if w_transposed:
        w_spec = pl.BlockSpec((tn, tk), lambda i, j, k: (j, k))
    else:
        w_spec = pl.BlockSpec((tk, tn), lambda i, j, k: (k, j))

    kern = functools.partial(_linear_kernel, activation=activation,
                             w_transposed=w_transposed)
    return pl.pallas_call(
        kern,
        out_shape=jax.ShapeDtypeStruct((M, N), x.dtype),
        grid=grid,
        in_specs=[pl.BlockSpec((tm, tk), lambda i, j, k: (i, k)),
                  w_spec,
                  pl.BlockSpec((1, tn), lambda i, j, k: (0, j))],
        out_specs=pl.BlockSpec((tm, tn), lambda i, j, k: (i, j)),
        scratch_shapes=[pltpu.VMEM((tm, tn), jnp.float32)],
        compiler_params=pltpu.CompilerParams(
            dimension_semantics=("parallel", "parallel", "arbitrary")),
    )(x, w, b.reshape(1, N))


def ffn(x, w1, b1, w2, b2, *, tm=256, tf=512):
    """relu(x @ w1 + b1) @ w2 + b2 without writing the wide hidden to HBM."""
    M, D = x.shape
    F = w1.shape[1]
    tm, tf = _fit(M, tm), _fit(F, tf)
    grid = (M // tm, F // tf)
    return pl.pallas_call(
        _ffn_kernel,
        out_shape=jax.ShapeDtypeStruct((M, D), x.dtype),
        grid=grid,
        in_specs=[pl.BlockSpec((tm, D), lambda i, f: (i, 0)),
                  pl.BlockSpec((D, tf), lambda i, f: (0, f)),
                  pl.BlockSpec((1, tf), lambda i, f: (0, f)),
                  pl.BlockSpec((tf, D), lambda i, f: (f, 0)),
                  pl.BlockSpec((1, D), lambda i, f: (0, 0))],
        out_specs=pl.BlockSpec((tm, D), lambda i, f: (i, 0)),
        scratch_shapes=[pltpu.VMEM((tm, D), jnp.float32)],
        compiler_params=pltpu.CompilerParams(
            dimension_semantics=("parallel", "arbitrary")),
    )(x, w1, b1.reshape(1, F), w2, b2.reshape(1, D))


def layernorm(x, gamma, beta, *, tm=512):
    M, D = x.shape
    tm = _fit(M, tm)
    return pl.pallas_call(
        _layernorm_kernel,
        out_shape=jax.ShapeDtypeStruct((M, D), x.dtype),
        grid=(M // tm,),
        in_specs=[pl.BlockSpec((tm, D), lambda i: (i, 0)),
                  pl.BlockSpec((1, D), lambda i: (0, 0)),
                  pl.BlockSpec((1, D), lambda i: (0, 0))],
        out_specs=pl.BlockSpec((tm, D), lambda i: (i, 0)),
        compiler_params=pltpu.CompilerParams(
            dimension_semantics=("parallel",)),
    )(x, gamma.reshape(1, D), beta.reshape(1, D))


def flash_attention(q, k, v, *, tq=128, tk=128):
    """Causal flash attention. q,k,v: (B*H, S, Dk) -> (B*H, S, Dk)."""
    BH, S, Dk = q.shape
    tq, tk = _fit(S, tq), _fit(S, tk)
    sm_scale = 1.0 / math.sqrt(Dk)
    kern = functools.partial(_flash_attn_kernel, sm_scale=sm_scale)
    return pl.pallas_call(
        kern,
        out_shape=jax.ShapeDtypeStruct((BH, S, Dk), q.dtype),
        grid=(BH, S // tq, S // tk),
        in_specs=[pl.BlockSpec((1, tq, Dk), lambda b, i, j: (b, i, 0)),
                  pl.BlockSpec((1, tk, Dk), lambda b, i, j: (b, j, 0)),
                  pl.BlockSpec((1, tk, Dk), lambda b, i, j: (b, j, 0))],
        out_specs=pl.BlockSpec((1, tq, Dk), lambda b, i, j: (b, i, 0)),
        scratch_shapes=[pltpu.VMEM((tq, 1), jnp.float32),
                        pltpu.VMEM((tq, 1), jnp.float32),
                        pltpu.VMEM((tq, Dk), jnp.float32)],
        compiler_params=pltpu.CompilerParams(
            dimension_semantics=("parallel", "parallel", "arbitrary")),
    )(q, k, v)


# ----------------------------- model ----------------------------------------

def sinusoidal_pe(seq_len, d_model):
    pos = jnp.arange(seq_len, dtype=jnp.float32)[:, None]
    i = jnp.arange(0, d_model, 2, dtype=jnp.float32)
    div = jnp.exp(-math.log(10000.0) * i / d_model)
    pe = jnp.zeros((seq_len, d_model), jnp.float32)
    pe = pe.at[:, 0::2].set(jnp.sin(pos * div))
    pe = pe.at[:, 1::2].set(jnp.cos(pos * div))
    return pe


def init_params(key, vocab, d_model, n_layers, d_ff, max_len=64):
    keys = iter(jax.random.split(key, 4 * n_layers + 2))

    def dense(shape, scale=0.02):
        # matmul weights stored bf16 (halves HBM traffic; f32 accumulation in-kernel)
        return (scale * jax.random.normal(next(keys), shape, jnp.float32)
                ).astype(jnp.bfloat16)

    params = {
        "emb": dense((vocab, d_model)),            # tied embedding / LM head weight
        "out_b": jnp.zeros((vocab,), jnp.float32),
        "fin_g": jnp.ones((d_model,), jnp.float32),
        "fin_b": jnp.zeros((d_model,), jnp.float32),
        "pe": sinusoidal_pe(max_len, d_model),     # hoisted out of the per-call path
        "layers": [],
    }
    for _ in range(n_layers):
        params["layers"].append({
            "ln1_g": jnp.ones((d_model,), jnp.float32),
            "ln1_b": jnp.zeros((d_model,), jnp.float32),
            "ln2_g": jnp.ones((d_model,), jnp.float32),
            "ln2_b": jnp.zeros((d_model,), jnp.float32),
            # fused QKV projection: (D, 3D)
            "wqkv": dense((d_model, 3 * d_model)),
            "bqkv": jnp.zeros((3 * d_model,), jnp.float32),
            "wo": dense((d_model, d_model)), "bo": jnp.zeros((d_model,), jnp.float32),
            "w1": dense((d_model, d_ff)),    "b1": jnp.zeros((d_ff,), jnp.float32),
            "w2": dense((d_ff, d_model)),    "b2": jnp.zeros((d_model,), jnp.float32),
        })
    return params


def gpt2_forward(params, token_ids, trg_mask, heads):
    # TODO(synk): trg_mask is assumed to be the standard causal mask; it is
    # regenerated in-kernel via iota (arbitrary masks would need an additive bias input).
    del trg_mask
    B, S = token_ids.shape
    V, D = params["emb"].shape
    H = heads
    Dk = D // H

    # embedding lookup (gather) + scale + positional encoding -- plain-JAX glue
    x = jnp.take(params["emb"], token_ids, axis=0).astype(jnp.float32)
    x = x * math.sqrt(D) + params["pe"][:S][None]
    # dropout layers are identity (inference / eval mode)

    for lp in params["layers"]:
        # --- masked multi-head self-attention block (pre-norm) ---
        x2 = layernorm(x.reshape(B * S, D), lp["ln1_g"], lp["ln1_b"])
        qkv = linear(x2, lp["wqkv"], lp["bqkv"])                     # (B*S, 3D)
        qkv = qkv.reshape(B, S, 3, H, Dk).transpose(2, 0, 3, 1, 4)   # (3,B,H,S,Dk)
        q = qkv[0].reshape(B * H, S, Dk)
        k = qkv[1].reshape(B * H, S, Dk)
        v = qkv[2].reshape(B * H, S, Dk)
        att = flash_attention(q, k, v)                               # (B*H, S, Dk)
        att = att.reshape(B, H, S, Dk).transpose(0, 2, 1, 3).reshape(B * S, D)
        x = x + linear(att, lp["wo"], lp["bo"]).reshape(B, S, D)

        # --- feed-forward block (pre-norm, ReLU), fused w1/relu/w2 ---
        x2 = layernorm(x.reshape(B * S, D), lp["ln2_g"], lp["ln2_b"])
        x = x + ffn(x2, lp["w1"], lp["b1"], lp["w2"], lp["b2"]).reshape(B, S, D)

    # final norm + tied output projection: logits = norm(x) @ emb.T + b
    # (emb.T is never materialized; the kernel contracts against emb directly)
    xf = layernorm(x.reshape(B * S, D), params["fin_g"], params["fin_b"])
    logits = linear(xf, params["emb"], params["out_b"], w_transposed=True)
    return logits.reshape(B, S, V)


# ----------------------------- main ------------------------------------------

if __name__ == "__main__":
    vocab_size = 64
    d_model = 32
    n_layers = 2
    heads = 4
    d_ff = 4 * d_model
    B, S = 2, 8

    key = jax.random.PRNGKey(0)
    k_params, k_tok = jax.random.split(key)
    params = init_params(k_params, vocab_size, d_model, n_layers, d_ff)

    token_ids = jax.random.randint(k_tok, (B, S), 0, vocab_size, dtype=jnp.int32)
    # causal target mask (kept for API compatibility; kernel builds it internally)
    trg_mask = jnp.tril(jnp.ones((S, S), jnp.float32))[None, None]   # (1,1,S,S)

    fwd = jax.jit(lambda p, ids, mask: gpt2_forward(p, ids, mask, heads))
    logits = fwd(params, token_ids, trg_mask)
    logits = jax.block_until_ready(logits)

    assert logits.shape == (B, S, vocab_size)
    assert bool(jnp.all(jnp.isfinite(logits)))
    print("KERNEL_OK")
</pallas_src>

<mosaic_0001>
module attributes {stable_mosaic.version = 11 : i64} {
  func.func @_linear_kernel(%arg0: i32, %arg1: i32, %arg2: i32, %arg3: memref<16x32xf32, #tpu.memory_space<vmem>>, %arg4: memref<32x96xbf16, #tpu.memory_space<vmem>>, %arg5: memref<1x96xf32, #tpu.memory_space<vmem>>, %arg6: memref<16x96xf32, #tpu.memory_space<vmem>>, %arg7: memref<16x96xf32, #tpu.memory_space<vmem>>) attributes {dimension_semantics = [#tpu.dimension_semantics<parallel>, #tpu.dimension_semantics<parallel>, #tpu.dimension_semantics<arbitrary>], iteration_bounds = array<i64: 1, 1, 1>, scalar_prefetch = 0 : i64, scratch_operands = 1 : i64, tpu.core_type = #tpu.core_type<tc>, window_params = [{transform_indices = @transform_0, window_bounds = array<i64: 16, 32>}, {transform_indices = @transform_1, window_bounds = array<i64: 32, 96>}, {transform_indices = @transform_2, window_bounds = array<i64: 1, 96>}, {transform_indices = @transform_3, window_bounds = array<i64: 16, 96>}]} {
    %c0_i32 = arith.constant 0 : i32
    %0 = arith.cmpi eq, %arg2, %c0_i32 : i32
    %1 = arith.extui %0 : i1 to i32
    %c0_i32_0 = arith.constant 0 : i32
    %2 = arith.cmpi ne, %1, %c0_i32_0 : i32
    scf.if %2 {
      %cst_10 = arith.constant 0.000000e+00 : f32
      %13 = vector.broadcast %cst_10 : f32 to vector<16x96xf32>
      %c0_11 = arith.constant 0 : index
      %c0_12 = arith.constant 0 : index
      %14 = vector.load %arg7[%c0_11, %c0_12] : memref<16x96xf32, #tpu.memory_space<vmem>>, vector<16x96xf32>
      tpu.vector_store %arg7[%c0_11, %c0_12], %13 {strides = array<i32>} : memref<16x96xf32, #tpu.memory_space<vmem>>, vector<16x96xf32>,
    } else {
    }
    %c0 = arith.constant 0 : index
    %c0_1 = arith.constant 0 : index
    %3 = vector.load %arg3[%c0, %c0_1] : memref<16x32xf32, #tpu.memory_space<vmem>>, vector<16x32xf32>
    %4 = arith.truncf %3 : vector<16x32xf32> to vector<16x32xbf16>
    %c0_2 = arith.constant 0 : index
    %c0_3 = arith.constant 0 : index
    %5 = vector.load %arg4[%c0_2, %c0_3] : memref<32x96xbf16, #tpu.memory_space<vmem>>, vector<32x96xbf16>
    %c0_4 = arith.constant 0 : index
    %c0_5 = arith.constant 0 : index
    %6 = vector.load %arg7[%c0_4, %c0_5] : memref<16x96xf32, #tpu.memory_space<vmem>>, vector<16x96xf32>
    %cst = arith.constant dense<0.000000e+00> : vector<16x96xf32>
    %7 = tpu.matmul %4, %5, %cst {dimension_numbers = #tpu.dot_dimension_numbers<[1], [0], [0], [1], [0, 0, 1, 1], [], []>} : vector<16x32xbf16>, vector<32x96xbf16>, vector<16x96xf32> -> vector<16x96xf32>
    %8 = arith.addf %6, %7 : vector<16x96xf32>
    %c0_6 = arith.constant 0 : index
    %c0_7 = arith.constant 0 : index
    %9 = vector.load %arg7[%c0_6, %c0_7] : memref<16x96xf32, #tpu.memory_space<vmem>>, vector<16x96xf32>
    tpu.vector_store %arg7[%c0_6, %c0_7], %8 {strides = array<i32>} : memref<16x96xf32, #tpu.memory_space<vmem>>, vector<16x96xf32>,
    %c0_i32_8 = arith.constant 0 : i32
    %10 = arith.cmpi eq, %arg2, %c0_i32_8 : i32
    %11 = arith.extui %10 : i1 to i32
    %c0_i32_9 = arith.constant 0 : i32
    %12 = arith.cmpi ne, %11, %c0_i32_9 : i32
    scf.if %12 {
      %c0_10 = arith.constant 0 : index
      %c0_11 = arith.constant 0 : index
      %13 = vector.load %arg7[%c0_10, %c0_11] : memref<16x96xf32, #tpu.memory_space<vmem>>, vector<16x96xf32>
      %c0_12 = arith.constant 0 : index
      %c0_13 = arith.constant 0 : index
      %14 = vector.load %arg5[%c0_12, %c0_13] : memref<1x96xf32, #tpu.memory_space<vmem>>, vector<1x96xf32>
      %15 = vector.broadcast %14 : vector<1x96xf32> to vector<16x96xf32>
      %16 = arith.addf %13, %15 : vector<16x96xf32>
      %c0_14 = arith.constant 0 : index
      %c0_15 = arith.constant 0 : index
      %17 = vector.load %arg6[%c0_14, %c0_15] : memref<16x96xf32, #tpu.memory_space<vmem>>, vector<16x96xf32>
      tpu.vector_store %arg6[%c0_14, %c0_15], %16 {strides = array<i32>} : memref<16x96xf32, #tpu.memory_space<vmem>>, vector<16x96xf32>,
    } else {
    }
    return
  }
  func.func @transform_0(%arg0: i32, %arg1: i32, %arg2: i32) -> (i32, i32) {
    %c0_i32 = arith.constant 0 : i32
    return %arg0, %arg2 : i32, i32
  }
  func.func @transform_1(%arg0: i32, %arg1: i32, %arg2: i32) -> (i32, i32) {
    %c0_i32 = arith.constant 0 : i32
    return %arg2, %arg1 : i32, i32
  }
  func.func @transform_2(%arg0: i32, %arg1: i32, %arg2: i32) -> (i32, i32) {
    %c0_i32 = arith.constant 0 : i32
    %c0_i32_0 = arith.constant 0 : i32
    return %c0_i32, %arg1 : i32, i32
  }
  func.func @transform_3(%arg0: i32, %arg1: i32, %arg2: i32) -> (i32, i32) {
    %c0_i32 = arith.constant 0 : i32
    return %arg0, %arg1 : i32, i32
  }
}

module attributes {stable_mosaic.version = 11 : i64} {
  func.func @_layernorm_kernel(%arg0: i32, %arg1: memref<16x32xf32, #tpu.memory_space<vmem>>, %arg2: memref<1x32xf32, #tpu.memory_space<vmem>>, %arg3: memref<1x32xf32, #tpu.memory_space<vmem>>, %arg4: memref<16x32xf32, #tpu.memory_space<vmem>>) attributes {dimension_semantics = [#tpu.dimension_semantics<parallel>], iteration_bounds = array<i64: 1>, scalar_prefetch = 0 : i64, scratch_operands = 0 : i64, tpu.core_type = #tpu.core_type<tc>, window_params = [{transform_indices = @transform_0, window_bounds = array<i64: 16, 32>}, {pipeline_mode = #tpu.pipeline_mode<synchronous>, transform_indices = @transform_1, window_bounds = array<i64: 1, 32>}, {pipeline_mode = #tpu.pipeline_mode<synchronous>, transform_indices = @transform_2, window_bounds = array<i64: 1, 32>}, {transform_indices = @transform_3, window_bounds = array<i64: 16, 32>}]} {
    %c0 = arith.constant 0 : index
    %c0_0 = arith.constant 0 : index
    %0 = vector.load %arg1[%c0, %c0_0] : memref<16x32xf32, #tpu.memory_space<vmem>>, vector<16x32xf32>
    %cst = arith.constant dense<0.000000e+00> : vector<16xf32>
    %1 = vector.multi_reduction <add>, %0, %cst [1] : vector<16x32xf32> to vector<16xf32>
    %2 = vector.shape_cast %1 : vector<16xf32> to vector<16x1xf32>
    %cst_1 = arith.constant 3.200000e+01 : f32
    %3 = vector.broadcast %cst_1 : f32 to vector<16x1xf32>
    %4 = arith.divf %2, %3 : vector<16x1xf32>
    %5 = vector.broadcast %4 : vector<16x1xf32> to vector<16x32xf32>
    %6 = arith.subf %0, %5 : vector<16x32xf32>
    %7 = arith.mulf %6, %6 : vector<16x32xf32>
    %cst_2 = arith.constant dense<0.000000e+00> : vector<16xf32>
    %8 = vector.multi_reduction <add>, %7, %cst_2 [1] : vector<16x32xf32> to vector<16xf32>
    %9 = vector.shape_cast %8 : vector<16xf32> to vector<16x1xf32>
    %cst_3 = arith.constant 3.200000e+01 : f32
    %10 = vector.broadcast %cst_3 : f32 to vector<16x1xf32>
    %11 = arith.divf %9, %10 : vector<16x1xf32>
    %cst_4 = arith.constant 9.99999974E-6 : f32
    %12 = vector.broadcast %cst_4 : f32 to vector<16x1xf32>
    %13 = arith.addf %11, %12 : vector<16x1xf32>
    %14 = math.rsqrt %13 : vector<16x1xf32>
    %15 = vector.broadcast %4 : vector<16x1xf32> to vector<16x32xf32>
    %16 = arith.subf %0, %15 : vector<16x32xf32>
    %17 = vector.broadcast %14 : vector<16x1xf32> to vector<16x32xf32>
    %18 = arith.mulf %16, %17 : vector<16x32xf32>
    %c0_5 = arith.constant 0 : index
    %c0_6 = arith.constant 0 : index
    %19 = vector.load %arg2[%c0_5, %c0_6] : memref<1x32xf32, #tpu.memory_space<vmem>>, vector<1x32xf32>
    %20 = vector.broadcast %19 : vector<1x32xf32> to vector<16x32xf32>
    %21 = arith.mulf %18, %20 : vector<16x32xf32>
    %c0_7 = arith.constant 0 : index
    %c0_8 = arith.constant 0 : index
    %22 = vector.load %arg3[%c0_7, %c0_8] : memref<1x32xf32, #tpu.memory_space<vmem>>, vector<1x32xf32>
    %23 = vector.broadcast %22 : vector<1x32xf32> to vector<16x32xf32>
    %24 = arith.addf %21, %23 : vector<16x32xf32>
    %c0_9 = arith.constant 0 : index
    %c0_10 = arith.constant 0 : index
    %25 = vector.load %arg4[%c0_9, %c0_10] : memref<16x32xf32, #tpu.memory_space<vmem>>, vector<16x32xf32>
    tpu.vector_store %arg4[%c0_9, %c0_10], %24 {strides = array<i32>} : memref<16x32xf32, #tpu.memory_space<vmem>>, vector<16x32xf32>,
    return
  }
  func.func @transform_0(%arg0: i32) -> (i32, i32) {
    %c0_i32 = arith.constant 0 : i32
    %c0_i32_0 = arith.constant 0 : i32
    return %arg0, %c0_i32 : i32, i32
  }
  func.func @transform_1(%arg0: i32) -> (i32, i32) {
    %c0_i32 = arith.constant 0 : i32
    %c0_i32_0 = arith.constant 0 : i32
    %c0_i32_1 = arith.constant 0 : i32
    return %c0_i32, %c0_i32_0 : i32, i32
  }
  func.func @transform_2(%arg0: i32) -> (i32, i32) {
    %c0_i32 = arith.constant 0 : i32
    %c0_i32_0 = arith.constant 0 : i32
    %c0_i32_1 = arith.constant 0 : i32
    return %c0_i32, %c0_i32_0 : i32, i32
  }
  func.func @transform_3(%arg0: i32) -> (i32, i32) {
    %c0_i32 = arith.constant 0 : i32
    %c0_i32_0 = arith.constant 0 : i32
    return %arg0, %c0_i32 : i32, i32
  }
}

module attributes {stable_mosaic.version = 11 : i64} {
  func.func @_flash_attn_kernel(%arg0: i32, %arg1: i32, %arg2: i32, %arg3: memref<1x8x8xf32, #tpu.memory_space<vmem>>, %arg4: memref<1x8x8xf32, #tpu.memory_space<vmem>>, %arg5: memref<1x8x8xf32, #tpu.memory_space<vmem>>, %arg6: memref<1x8x8xf32, #tpu.memory_space<vmem>>, %arg7: memref<8x1xf32, #tpu.memory_space<vmem>>, %arg8: memref<8x1xf32, #tpu.memory_space<vmem>>, %arg9: memref<8x8xf32, #tpu.memory_space<vmem>>) attributes {dimension_semantics = [#tpu.dimension_semantics<parallel>, #tpu.dimension_semantics<parallel>, #tpu.dimension_semantics<arbitrary>], iteration_bounds = array<i64: 8, 1, 1>, scalar_prefetch = 0 : i64, scratch_operands = 3 : i64, tpu.core_type = #tpu.core_type<tc>, window_params = [{transform_indices = @transform_0, window_bounds = array<i64: 1, 8, 8>}, {transform_indices = @transform_1, window_bounds = array<i64: 1, 8, 8>}, {transform_indices = @transform_2, window_bounds = array<i64: 1, 8, 8>}, {transform_indices = @transform_3, window_bounds = array<i64: 1, 8, 8>}]} {
    %c8_i32 = arith.constant 8 : i32
    %0 = arith.muli %arg1, %c8_i32 : i32
    %c8_i32_0 = arith.constant 8 : i32
    %1 = arith.muli %arg2, %c8_i32_0 : i32
    %c0_i32 = arith.constant 0 : i32
    %2 = arith.cmpi eq, %arg2, %c0_i32 : i32
    %3 = arith.extui %2 : i1 to i32
    %c0_i32_1 = arith.constant 0 : i32
    %4 = arith.cmpi ne, %3, %c0_i32_1 : i32
    scf.if %4 {
      %cst = arith.constant 0xFF800000 : f32
      %13 = vector.broadcast %cst : f32 to vector<8x1xf32>
      %c0 = arith.constant 0 : index
      %c0_6 = arith.constant 0 : index
      %14 = vector.load %arg7[%c0, %c0_6] : memref<8x1xf32, #tpu.memory_space<vmem>>, vector<8x1xf32>
      tpu.vector_store %arg7[%c0, %c0_6], %13 {strides = array<i32>} : memref<8x1xf32, #tpu.memory_space<vmem>>, vector<8x1xf32>,
      %cst_7 = arith.constant 0.000000e+00 : f32
      %15 = vector.broadcast %cst_7 : f32 to vector<8x1xf32>
      %c0_8 = arith.constant 0 : index
      %c0_9 = arith.constant 0 : index
      %16 = vector.load %arg8[%c0_8, %c0_9] : memref<8x1xf32, #tpu.memory_space<vmem>>, vector<8x1xf32>
      tpu.vector_store %arg8[%c0_8, %c0_9], %15 {strides = array<i32>} : memref<8x1xf32, #tpu.memory_space<vmem>>, vector<8x1xf32>,
      %cst_10 = arith.constant 0.000000e+00 : f32
      %17 = vector.broadcast %cst_10 : f32 to vector<8x8xf32>
      %c0_11 = arith.constant 0 : index
      %c0_12 = arith.constant 0 : index
      %18 = vector.load %arg9[%c0_11, %c0_12] : memref<8x8xf32, #tpu.memory_space<vmem>>, vector<8x8xf32>
      tpu.vector_store %arg9[%c0_11, %c0_12], %17 {strides = array<i32>} : memref<8x8xf32, #tpu.memory_space<vmem>>, vector<8x8xf32>,
    } else {
    }
    %c8_i32_2 = arith.constant 8 : i32
    %5 = arith.addi %0, %c8_i32_2 : i32
    %c1_i32 = arith.constant 1 : i32
    %6 = arith.subi %5, %c1_i32 : i32
    %7 = arith.cmpi sle, %1, %6 : i32
    %8 = arith.extui %7 : i1 to i32
    %c0_i32_3 = arith.constant 0 : i32
    %9 = arith.cmpi ne, %8, %c0_i32_3 : i32
    scf.if %9 {
      %c0 = arith.constant 0 : index
      %c0_6 = arith.constant 0 : index
      %c0_7 = arith.constant 0 : index
      %13 = vector.load %arg3[%c0, %c0_6, %c0_7] : memref<1x8x8xf32, #tpu.memory_space<vmem>>, vector<1x8x8xf32>
      %14 = vector.shape_cast %13 : vector<1x8x8xf32> to vector<8x8xf32>
      %cst = arith.constant 0.353553385 : f32
      %15 = vector.broadcast %cst : f32 to vector<8x8xf32>
      %16 = arith.mulf %14, %15 : vector<8x8xf32>
      %17 = arith.truncf %16 : vector<8x8xf32> to vector<8x8xbf16>
      %c0_8 = arith.constant 0 : index
      %c0_9 = arith.constant 0 : index
      %c0_10 = arith.constant 0 : index
      %18 = vector.load %arg4[%c0_8, %c0_9, %c0_10] : memref<1x8x8xf32, #tpu.memory_space<vmem>>, vector<1x8x8xf32>
      %19 = vector.shape_cast %18 : vector<1x8x8xf32> to vector<8x8xf32>
      %20 = arith.truncf %19 : vector<8x8xf32> to vector<8x8xbf16>
      %cst_11 = arith.constant dense<0.000000e+00> : vector<8x8xf32>
      %21 = tpu.matmul %17, %20, %cst_11 {dimension_numbers = #tpu.dot_dimension_numbers<[1], [1], [0], [0], [0, 0, 1, 0], [], []>} : vector<8x8xbf16>, vector<8x8xbf16>, vector<8x8xf32> -> vector<8x8xf32>
      %22 = tpu.iota {dimensions = array<i32: 0>} : vector<8x8xi32>
      %23 = vector.broadcast %0 : i32 to vector<8x8xi32>
      %24 = arith.addi %23, %22 : vector<8x8xi32>
      %25 = tpu.iota {dimensions = array<i32: 1>} : vector<8x8xi32>
      %26 = vector.broadcast %1 : i32 to vector<8x8xi32>
      %27 = arith.addi %26, %25 : vector<8x8xi32>
      %28 = arith.cmpi sge, %24, %27 : vector<8x8xi32>
      %cst_12 = arith.constant -1.000000e+09 : f32
      %29 = vector.broadcast %cst_12 : f32 to vector<8x8xf32>
      %30 = arith.select %28, %21, %29 : vector<8x8xi1>, vector<8x8xf32>
      %c0_13 = arith.constant 0 : index
      %c0_14 = arith.constant 0 : index
      %31 = vector.load %arg7[%c0_13, %c0_14] : memref<8x1xf32, #tpu.memory_space<vmem>>, vector<8x1xf32>
      %cst_15 = arith.constant dense<0xFF800000> : vector<8xf32>
      %32 = vector.multi_reduction <maximumf>, %30, %cst_15 [1] : vector<8x8xf32> to vector<8xf32>
      %33 = vector.shape_cast %32 : vector<8xf32> to vector<8x1xf32>
      %34 = arith.maximumf %31, %33 : vector<8x1xf32>
      %35 = arith.subf %31, %34 : vector<8x1xf32>
      %36 = math.exp %35 : vector<8x1xf32>
      %37 = vector.broadcast %34 : vector<8x1xf32> to vector<8x8xf32>
      %38 = arith.subf %30, %37 : vector<8x8xf32>
      %39 = math.exp %38 : vector<8x8xf32>
      %c0_16 = arith.constant 0 : index
      %c0_17 = arith.constant 0 : index
      %40 = vector.load %arg8[%c0_16, %c0_17] : memref<8x1xf32, #tpu.memory_space<vmem>>, vector<8x1xf32>
      %41 = arith.mulf %36, %40 : vector<8x1xf32>
      %cst_18 = arith.constant dense<0.000000e+00> : vector<8xf32>
      %42 = vector.multi_reduction <add>, %39, %cst_18 [1] : vector<8x8xf32> to vector<8xf32>
      %43 = vector.shape_cast %42 : vector<8xf32> to vector<8x1xf32>
      %44 = arith.addf %41, %43 : vector<8x1xf32>
      %c0_19 = arith.constant 0 : index
      %c0_20 = arith.constant 0 : index
      %45 = vector.load %arg8[%c0_19, %c0_20] : memref<8x1xf32, #tpu.memory_space<vmem>>, vector<8x1xf32>
      tpu.vector_store %arg8[%c0_19, %c0_20], %44 {strides = array<i32>} : memref<8x1xf32, #tpu.memory_space<vmem>>, vector<8x1xf32>,
      %c0_21 = arith.constant 0 : index
      %c0_22 = arith.constant 0 : index
      %46 = vector.load %arg9[%c0_21, %c0_22] : memref<8x8xf32, #tpu.memory_space<vmem>>, vector<8x8xf32>
      %47 = vector.broadcast %36 : vector<8x1xf32> to vector<8x8xf32>
      %48 = arith.mulf %47, %46 : vector<8x8xf32>
      %49 = arith.truncf %39 : vector<8x8xf32> to vector<8x8xbf16>
      %c0_23 = arith.constant 0 : index
      %c0_24 = arith.constant 0 : index
      %c0_25 = arith.constant 0 : index
      %50 = vector.load %arg5[%c0_23, %c0_24, %c0_25] : memref<1x8x8xf32, #tpu.memory_space<vmem>>, vector<1x8x8xf32>
      %51 = vector.shape_cast %50 : vector<1x8x8xf32> to vector<8x8xf32>
      %52 = arith.truncf %51 : vector<8x8xf32> to vector<8x8xbf16>
      %cst_26 = arith.constant dense<0.000000e+00> : vector<8x8xf32>
      %53 = tpu.matmul %49, %52, %cst_26 {dimension_numbers = #tpu.dot_dimension_numbers<[1], [0], [0], [1], [0, 0, 1, 1], [], []>} : vector<8x8xbf16>, vector<8x8xbf16>, vector<8x8xf32> -> vector<8x8xf32>
      %54 = arith.addf %48, %53 : vector<8x8xf32>
      %c0_27 = arith.constant 0 : index
      %c0_28 = arith.constant 0 : index
      %55 = vector.load %arg9[%c0_27, %c0_28] : memref<8x8xf32, #tpu.memory_space<vmem>>, vector<8x8xf32>
      tpu.vector_store %arg9[%c0_27, %c0_28], %54 {strides = array<i32>} : memref<8x8xf32, #tpu.memory_space<vmem>>, vector<8x8xf32>,
      %c0_29 = arith.constant 0 : index
      %c0_30 = arith.constant 0 : index
      %56 = vector.load %arg7[%c0_29, %c0_30] : memref<8x1xf32, #tpu.memory_space<vmem>>, vector<8x1xf32>
      tpu.vector_store %arg7[%c0_29, %c0_30], %34 {strides = array<i32>} : memref<8x1xf32, #tpu.memory_space<vmem>>, vector<8x1xf32>,
    } else {
    }
    %c0_i32_4 = arith.constant 0 : i32
    %10 = arith.cmpi eq, %arg2, %c0_i32_4 : i32
    %11 = arith.extui %10 : i1 to i32
    %c0_i32_5 = arith.constant 0 : i32
    %12 = arith.cmpi ne, %11, %c0_i32_5 : i32
    scf.if %12 {
      %c0 = arith.constant 0 : index
      %c0_6 = arith.constant 0 : index
      %13 = vector.load %arg9[%c0, %c0_6] : memref<8x8xf32, #tpu.memory_space<vmem>>, vector<8x8xf32>
      %c0_7 = arith.constant 0 : index
      %c0_8 = arith.constant 0 : index
      %14 = vector.load %arg8[%c0_7, %c0_8] : memref<8x1xf32, #tpu.memory_space<vmem>>, vector<8x1xf32>
      %15 = tpu.reciprocal %14 {approx = true} : vector<8x1xf32> -> vector<8x1xf32>
      %16 = vector.broadcast %15 : vector<8x1xf32> to vector<8x8xf32>
      %17 = arith.mulf %13, %16 : vector<8x8xf32>
      %18 = vector.shape_cast %17 : vector<8x8xf32> to vector<1x8x8xf32>
      %c0_9 = arith.constant 0 : index
      %c0_10 = arith.constant 0 : index
      %c0_11 = arith.constant 0 : index
      %19 = vector.load %arg6[%c0_9, %c0_10, %c0_11] : memref<1x8x8xf32, #tpu.memory_space<vmem>>, vector<1x8x8xf32>
      tpu.vector_store %arg6[%c0_9, %c0_10, %c0_11], %18 {strides = array<i32>} : memref<1x8x8xf32, #tpu.memory_space<vmem>>, vector<1x8x8xf32>,
    } else {
    }
    return
  }
  func.func @transform_0(%arg0: i32, %arg1: i32, %arg2: i32) -> (i32, i32, i32) {
    %c0_i32 = arith.constant 0 : i32
    %c0_i32_0 = arith.constant 0 : i32
    return %arg0, %arg1, %c0_i32 : i32, i32, i32
  }
  func.func @transform_1(%arg0: i32, %arg1: i32, %arg2: i32) -> (i32, i32, i32) {
    %c0_i32 = arith.constant 0 : i32
    %c0_i32_0 = arith.constant 0 : i32
    return %arg0, %arg2, %c0_i32 : i32, i32, i32
  }
  func.func @transform_2(%arg0: i32, %arg1: i32, %arg2: i32) -> (i32, i32, i32) {
    %c0_i32 = arith.constant 0 : i32
    %c0_i32_0 = arith.constant 0 : i32
    return %arg0, %arg2, %c0_i32 : i32, i32, i32
  }
  func.func @transform_3(%arg0: i32, %arg1: i32, %arg2: i32) -> (i32, i32, i32) {
    %c0_i32 = arith.constant 0 : i32
    %c0_i32_0 = arith.constant 0 : i32
    return %arg0, %arg1, %c0_i32 : i32, i32, i32
  }
}

module attributes {stable_mosaic.version = 11 : i64} {
  func.func @_linear_kernel(%arg0: i32, %arg1: i32, %arg2: i32, %arg3: memref<16x32xf32, #tpu.memory_space<vmem>>, %arg4: memref<32x32xbf16, #tpu.memory_space<vmem>>, %arg5: memref<1x32xf32, #tpu.memory_space<vmem>>, %arg6: memref<16x32xf32, #tpu.memory_space<vmem>>, %arg7: memref<16x32xf32, #tpu.memory_space<vmem>>) attributes {dimension_semantics = [#tpu.dimension_semantics<parallel>, #tpu.dimension_semantics<parallel>, #tpu.dimension_semantics<arbitrary>], iteration_bounds = array<i64: 1, 1, 1>, scalar_prefetch = 0 : i64, scratch_operands = 1 : i64, tpu.core_type = #tpu.core_type<tc>, window_params = [{transform_indices = @transform_0, window_bounds = array<i64: 16, 32>}, {transform_indices = @transform_1, window_bounds = array<i64: 32, 32>}, {transform_indices = @transform_2, window_bounds = array<i64: 1, 32>}, {transform_indices = @transform_3, window_bounds = array<i64: 16, 32>}]} {
    %c0_i32 = arith.constant 0 : i32
    %0 = arith.cmpi eq, %arg2, %c0_i32 : i32
    %1 = arith.extui %0 : i1 to i32
    %c0_i32_0 = arith.constant 0 : i32
    %2 = arith.cmpi ne, %1, %c0_i32_0 : i32
    scf.if %2 {
      %cst_10 = arith.constant 0.000000e+00 : f32
      %13 = vector.broadcast %cst_10 : f32 to vector<16x32xf32>
      %c0_11 = arith.constant 0 : index
      %c0_12 = arith.constant 0 : index
      %14 = vector.load %arg7[%c0_11, %c0_12] : memref<16x32xf32, #tpu.memory_space<vmem>>, vector<16x32xf32>
      tpu.vector_store %arg7[%c0_11, %c0_12], %13 {strides = array<i32>} : memref<16x32xf32, #tpu.memory_space<vmem>>, vector<16x32xf32>,
    } else {
    }
    %c0 = arith.constant 0 : index
    %c0_1 = arith.constant 0 : index
    %3 = vector.load %arg3[%c0, %c0_1] : memref<16x32xf32, #tpu.memory_space<vmem>>, vector<16x32xf32>
    %4 = arith.truncf %3 : vector<16x32xf32> to vector<16x32xbf16>
    %c0_2 = arith.constant 0 : index
    %c0_3 = arith.constant 0 : index
    %5 = vector.load %arg4[%c0_2, %c0_3] : memref<32x32xbf16, #tpu.memory_space<vmem>>, vector<32x32xbf16>
    %c0_4 = arith.constant 0 : index
    %c0_5 = arith.constant 0 : index
    %6 = vector.load %arg7[%c0_4, %c0_5] : memref<16x32xf32, #tpu.memory_space<vmem>>, vector<16x32xf32>
    %cst = arith.constant dense<0.000000e+00> : vector<16x32xf32>
    %7 = tpu.matmul %4, %5, %cst {dimension_numbers = #tpu.dot_dimension_numbers<[1], [0], [0], [1], [0, 0, 1, 1], [], []>} : vector<16x32xbf16>, vector<32x32xbf16>, vector<16x32xf32> -> vector<16x32xf32>
    %8 = arith.addf %6, %7 : vector<16x32xf32>
    %c0_6 = arith.constant 0 : index
    %c0_7 = arith.constant 0 : index
    %9 = vector.load %arg7[%c0_6, %c0_7] : memref<16x32xf32, #tpu.memory_space<vmem>>, vector<16x32xf32>
    tpu.vector_store %arg7[%c0_6, %c0_7], %8 {strides = array<i32>} : memref<16x32xf32, #tpu.memory_space<vmem>>, vector<16x32xf32>,
    %c0_i32_8 = arith.constant 0 : i32
    %10 = arith.cmpi eq, %arg2, %c0_i32_8 : i32
    %11 = arith.extui %10 : i1 to i32
    %c0_i32_9 = arith.constant 0 : i32
    %12 = arith.cmpi ne, %11, %c0_i32_9 : i32
    scf.if %12 {
      %c0_10 = arith.constant 0 : index
      %c0_11 = arith.constant 0 : index
      %13 = vector.load %arg7[%c0_10, %c0_11] : memref<16x32xf32, #tpu.memory_space<vmem>>, vector<16x32xf32>
      %c0_12 = arith.constant 0 : index
      %c0_13 = arith.constant 0 : index
      %14 = vector.load %arg5[%c0_12, %c0_13] : memref<1x32xf32, #tpu.memory_space<vmem>>, vector<1x32xf32>
      %15 = vector.broadcast %14 : vector<1x32xf32> to vector<16x32xf32>
      %16 = arith.addf %13, %15 : vector<16x32xf32>
      %c0_14 = arith.constant 0 : index
      %c0_15 = arith.constant 0 : index
      %17 = vector.load %arg6[%c0_14, %c0_15] : memref<16x32xf32, #tpu.memory_space<vmem>>, vector<16x32xf32>
      tpu.vector_store %arg6[%c0_14, %c0_15], %16 {strides = array<i32>} : memref<16x32xf32, #tpu.memory_space<vmem>>, vector<16x32xf32>,
    } else {
    }
    return
  }
  func.func @transform_0(%arg0: i32, %arg1: i32, %arg2: i32) -> (i32, i32) {
    %c0_i32 = arith.constant 0 : i32
    return %arg0, %arg2 : i32, i32
  }
  func.func @transform_1(%arg0: i32, %arg1: i32, %arg2: i32) -> (i32, i32) {
    %c0_i32 = arith.constant 0 : i32
    return %arg2, %arg1 : i32, i32
  }
  func.func @transform_2(%arg0: i32, %arg1: i32, %arg2: i32) -> (i32, i32) {
    %c0_i32 = arith.constant 0 : i32
    %c0_i32_0 = arith.constant 0 : i32
    return %c0_i32, %arg1 : i32, i32
  }
  func.func @transform_3(%arg0: i32, %arg1: i32, %arg2: i32) -> (i32, i32) {
    %c0_i32 = arith.constant 0 : i32
    return %arg0, %arg1 : i32, i32
  }
}

module attributes {stable_mosaic.version = 11 : i64} {
  func.func @_ffn_kernel(%arg0: i32, %arg1: i32, %arg2: memref<16x32xf32, #tpu.memory_space<vmem>>, %arg3: memref<32x128xbf16, #tpu.memory_space<vmem>>, %arg4: memref<1x128xf32, #tpu.memory_space<vmem>>, %arg5: memref<128x32xbf16, #tpu.memory_space<vmem>>, %arg6: memref<1x32xf32, #tpu.memory_space<vmem>>, %arg7: memref<16x32xf32, #tpu.memory_space<vmem>>, %arg8: memref<16x32xf32, #tpu.memory_space<vmem>>) attributes {dimension_semantics = [#tpu.dimension_semantics<parallel>, #tpu.dimension_semantics<arbitrary>], iteration_bounds = array<i64: 1, 1>, scalar_prefetch = 0 : i64, scratch_operands = 1 : i64, tpu.core_type = #tpu.core_type<tc>, window_params = [{transform_indices = @transform_0, window_bounds = array<i64: 16, 32>}, {transform_indices = @transform_1, window_bounds = array<i64: 32, 128>}, {transform_indices = @transform_2, window_bounds = array<i64: 1, 128>}, {transform_indices = @transform_3, window_bounds = array<i64: 128, 32>}, {pipeline_mode = #tpu.pipeline_mode<synchronous>, transform_indices = @transform_4, window_bounds = array<i64: 1, 32>}, {transform_indices = @transform_5, window_bounds = array<i64: 16, 32>}]} {
    %c0_i32 = arith.constant 0 : i32
    %0 = arith.cmpi eq, %arg1, %c0_i32 : i32
    %1 = arith.extui %0 : i1 to i32
    %c0_i32_0 = arith.constant 0 : i32
    %2 = arith.cmpi ne, %1, %c0_i32_0 : i32
    scf.if %2 {
      %cst_16 = arith.constant 0.000000e+00 : f32
      %21 = vector.broadcast %cst_16 : f32 to vector<16x32xf32>
      %c0_17 = arith.constant 0 : index
      %c0_18 = arith.constant 0 : index
      %22 = vector.load %arg8[%c0_17, %c0_18] : memref<16x32xf32, #tpu.memory_space<vmem>>, vector<16x32xf32>
      tpu.vector_store %arg8[%c0_17, %c0_18], %21 {strides = array<i32>} : memref<16x32xf32, #tpu.memory_space<vmem>>, vector<16x32xf32>,
    } else {
    }
    %c0 = arith.constant 0 : index
    %c0_1 = arith.constant 0 : index
    %3 = vector.load %arg2[%c0, %c0_1] : memref<16x32xf32, #tpu.memory_space<vmem>>, vector<16x32xf32>
    %4 = arith.truncf %3 : vector<16x32xf32> to vector<16x32xbf16>
    %c0_2 = arith.constant 0 : index
    %c0_3 = arith.constant 0 : index
    %5 = vector.load %arg3[%c0_2, %c0_3] : memref<32x128xbf16, #tpu.memory_space<vmem>>, vector<32x128xbf16>
    %cst = arith.constant dense<0.000000e+00> : vector<16x128xf32>
    %6 = tpu.matmul %4, %5, %cst {dimension_numbers = #tpu.dot_dimension_numbers<[1], [0], [0], [1], [0, 0, 1, 1], [], []>} : vector<16x32xbf16>, vector<32x128xbf16>, vector<16x128xf32> -> vector<16x128xf32>
    %c0_4 = arith.constant 0 : index
    %c0_5 = arith.constant 0 : index
    %7 = vector.load %arg4[%c0_4, %c0_5] : memref<1x128xf32, #tpu.memory_space<vmem>>, vector<1x128xf32>
    %8 = vector.broadcast %7 : vector<1x128xf32> to vector<16x128xf32>
    %9 = arith.addf %6, %8 : vector<16x128xf32>
    %cst_6 = arith.constant 0.000000e+00 : f32
    %10 = vector.broadcast %cst_6 : f32 to vector<16x128xf32>
    %11 = arith.maximumf %9, %10 : vector<16x128xf32>
    %c0_7 = arith.constant 0 : index
    %c0_8 = arith.constant 0 : index
    %12 = vector.load %arg8[%c0_7, %c0_8] : memref<16x32xf32, #tpu.memory_space<vmem>>, vector<16x32xf32>
    %13 = arith.truncf %11 : vector<16x128xf32> to vector<16x128xbf16>
    %c0_9 = arith.constant 0 : index
    %c0_10 = arith.constant 0 : index
    %14 = vector.load %arg5[%c0_9, %c0_10] : memref<128x32xbf16, #tpu.memory_space<vmem>>, vector<128x32xbf16>
    %cst_11 = arith.constant dense<0.000000e+00> : vector<16x32xf32>
    %15 = tpu.matmul %13, %14, %cst_11 {dimension_numbers = #tpu.dot_dimension_numbers<[1], [0], [0], [1], [0, 0, 1, 1], [], []>} : vector<16x128xbf16>, vector<128x32xbf16>, vector<16x32xf32> -> vector<16x32xf32>
    %16 = arith.addf %12, %15 : vector<16x32xf32>
    %c0_12 = arith.constant 0 : index
    %c0_13 = arith.constant 0 : index
    %17 = vector.load %arg8[%c0_12, %c0_13] : memref<16x32xf32, #tpu.memory_space<vmem>>, vector<16x32xf32>
    tpu.vector_store %arg8[%c0_12, %c0_13], %16 {strides = array<i32>} : memref<16x32xf32, #tpu.memory_space<vmem>>, vector<16x32xf32>,
    %c0_i32_14 = arith.constant 0 : i32
    %18 = arith.cmpi eq, %arg1, %c0_i32_14 : i32
    %19 = arith.extui %18 : i1 to i32
    %c0_i32_15 = arith.constant 0 : i32
    %20 = arith.cmpi ne, %19, %c0_i32_15 : i32
    scf.if %20 {
      %c0_16 = arith.constant 0 : index
      %c0_17 = arith.constant 0 : index
      %21 = vector.load %arg8[%c0_16, %c0_17] : memref<16x32xf32, #tpu.memory_space<vmem>>, vector<16x32xf32>
      %c0_18 = arith.constant 0 : index
      %c0_19 = arith.constant 0 : index
      %22 = vector.load %arg6[%c0_18, %c0_19] : memref<1x32xf32, #tpu.memory_space<vmem>>, vector<1x32xf32>
      %23 = vector.broadcast %22 : vector<1x32xf32> to vector<16x32xf32>
      %24 = arith.addf %21, %23 : vector<16x32xf32>
      %c0_20 = arith.constant 0 : index
      %c0_21 = arith.constant 0 : index
      %25 = vector.load %arg7[%c0_20, %c0_21] : memref<16x32xf32, #tpu.memory_space<vmem>>, vector<16x32xf32>
      tpu.vector_store %arg7[%c0_20, %c0_21], %24 {strides = array<i32>} : memref<16x32xf32, #tpu.memory_space<vmem>>, vector<16x32xf32>,
    } else {
    }
    return
  }
  func.func @transform_0(%arg0: i32, %arg1: i32) -> (i32, i32) {
    %c0_i32 = arith.constant 0 : i32
    %c0_i32_0 = arith.constant 0 : i32
    return %arg0, %c0_i32 : i32, i32
  }
  func.func @transform_1(%arg0: i32, %arg1: i32) -> (i32, i32) {
    %c0_i32 = arith.constant 0 : i32
    %c0_i32_0 = arith.constant 0 : i32
    return %c0_i32, %arg1 : i32, i32
  }
  func.func @transform_2(%arg0: i32, %arg1: i32) -> (i32, i32) {
    %c0_i32 = arith.constant 0 : i32
    %c0_i32_0 = arith.constant 0 : i32
    return %c0_i32, %arg1 : i32, i32
  }
  func.func @transform_3(%arg0: i32, %arg1: i32) -> (i32, i32) {
    %c0_i32 = arith.constant 0 : i32
    %c0_i32_0 = arith.constant 0 : i32
    return %arg1, %c0_i32 : i32, i32
  }
  func.func @transform_4(%arg0: i32, %arg1: i32) -> (i32, i32) {
    %c0_i32 = arith.constant 0 : i32
    %c0_i32_0 = arith.constant 0 : i32
    %c0_i32_1 = arith.constant 0 : i32
    return %c0_i32, %c0_i32_0 : i32, i32
  }
  func.func @transform_5(%arg0: i32, %arg1: i32) -> (i32, i32) {
    %c0_i32 = arith.constant 0 : i32
    %c0_i32_0 = arith.constant 0 : i32
    return %arg0, %c0_i32 : i32, i32
  }
}

module attributes {stable_mosaic.version = 11 : i64} {
  func.func @_linear_kernel(%arg0: i32, %arg1: i32, %arg2: i32, %arg3: memref<16x32xf32, #tpu.memory_space<vmem>>, %arg4: memref<64x32xbf16, #tpu.memory_space<vmem>>, %arg5: memref<1x64xf32, #tpu.memory_space<vmem>>, %arg6: memref<16x64xf32, #tpu.memory_space<vmem>>, %arg7: memref<16x64xf32, #tpu.memory_space<vmem>>) attributes {dimension_semantics = [#tpu.dimension_semantics<parallel>, #tpu.dimension_semantics<parallel>, #tpu.dimension_semantics<arbitrary>], iteration_bounds = array<i64: 1, 1, 1>, scalar_prefetch = 0 : i64, scratch_operands = 1 : i64, tpu.core_type = #tpu.core_type<tc>, window_params = [{transform_indices = @transform_0, window_bounds = array<i64: 16, 32>}, {transform_indices = @transform_1, window_bounds = array<i64: 64, 32>}, {transform_indices = @transform_2, window_bounds = array<i64: 1, 64>}, {transform_indices = @transform_3, window_bounds = array<i64: 16, 64>}]} {
    %c0_i32 = arith.constant 0 : i32
    %0 = arith.cmpi eq, %arg2, %c0_i32 : i32
    %1 = arith.extui %0 : i1 to i32
    %c0_i32_0 = arith.constant 0 : i32
    %2 = arith.cmpi ne, %1, %c0_i32_0 : i32
    scf.if %2 {
      %cst_10 = arith.constant 0.000000e+00 : f32
      %13 = vector.broadcast %cst_10 : f32 to vector<16x64xf32>
      %c0_11 = arith.constant 0 : index
      %c0_12 = arith.constant 0 : index
      %14 = vector.load %arg7[%c0_11, %c0_12] : memref<16x64xf32, #tpu.memory_space<vmem>>, vector<16x64xf32>
      tpu.vector_store %arg7[%c0_11, %c0_12], %13 {strides = array<i32>} : memref<16x64xf32, #tpu.memory_space<vmem>>, vector<16x64xf32>,
    } else {
    }
    %c0 = arith.constant 0 : index
    %c0_1 = arith.constant 0 : index
    %3 = vector.load %arg3[%c0, %c0_1] : memref<16x32xf32, #tpu.memory_space<vmem>>, vector<16x32xf32>
    %4 = arith.truncf %3 : vector<16x32xf32> to vector<16x32xbf16>
    %c0_2 = arith.constant 0 : index
    %c0_3 = arith.constant 0 : index
    %5 = vector.load %arg4[%c0_2, %c0_3] : memref<64x32xbf16, #tpu.memory_space<vmem>>, vector<64x32xbf16>
    %c0_4 = arith.constant 0 : index
    %c0_5 = arith.constant 0 : index
    %6 = vector.load %arg7[%c0_4, %c0_5] : memref<16x64xf32, #tpu.memory_space<vmem>>, vector<16x64xf32>
    %cst = arith.constant dense<0.000000e+00> : vector<16x64xf32>
    %7 = tpu.matmul %4, %5, %cst {dimension_numbers = #tpu.dot_dimension_numbers<[1], [1], [0], [0], [0, 0, 1, 0], [], []>} : vector<16x32xbf16>, vector<64x32xbf16>, vector<16x64xf32> -> vector<16x64xf32>
    %8 = arith.addf %6, %7 : vector<16x64xf32>
    %c0_6 = arith.constant 0 : index
    %c0_7 = arith.constant 0 : index
    %9 = vector.load %arg7[%c0_6, %c0_7] : memref<16x64xf32, #tpu.memory_space<vmem>>, vector<16x64xf32>
    tpu.vector_store %arg7[%c0_6, %c0_7], %8 {strides = array<i32>} : memref<16x64xf32, #tpu.memory_space<vmem>>, vector<16x64xf32>,
    %c0_i32_8 = arith.constant 0 : i32
    %10 = arith.cmpi eq, %arg2, %c0_i32_8 : i32
    %11 = arith.extui %10 : i1 to i32
    %c0_i32_9 = arith.constant 0 : i32
    %12 = arith.cmpi ne, %11, %c0_i32_9 : i32
    scf.if %12 {
      %c0_10 = arith.constant 0 : index
      %c0_11 = arith.constant 0 : index
      %13 = vector.load %arg7[%c0_10, %c0_11] : memref<16x64xf32, #tpu.memory_space<vmem>>, vector<16x64xf32>
      %c0_12 = arith.constant 0 : index
      %c0_13 = arith.constant 0 : index
      %14 = vector.load %arg5[%c0_12, %c0_13] : memref<1x64xf32, #tpu.memory_space<vmem>>, vector<1x64xf32>
      %15 = vector.broadcast %14 : vector<1x64xf32> to vector<16x64xf32>
      %16 = arith.addf %13, %15 : vector<16x64xf32>
      %c0_14 = arith.constant 0 : index
      %c0_15 = arith.constant 0 : index
      %17 = vector.load %arg6[%c0_14, %c0_15] : memref<16x64xf32, #tpu.memory_space<vmem>>, vector<16x64xf32>
      tpu.vector_store %arg6[%c0_14, %c0_15], %16 {strides = array<i32>} : memref<16x64xf32, #tpu.memory_space<vmem>>, vector<16x64xf32>,
    } else {
    }
    return
  }
  func.func @transform_0(%arg0: i32, %arg1: i32, %arg2: i32) -> (i32, i32) {
    %c0_i32 = arith.constant 0 : i32
    return %arg0, %arg2 : i32, i32
  }
  func.func @transform_1(%arg0: i32, %arg1: i32, %arg2: i32) -> (i32, i32) {
    %c0_i32 = arith.constant 0 : i32
    return %arg1, %arg2 : i32, i32
  }
  func.func @transform_2(%arg0: i32, %arg1: i32, %arg2: i32) -> (i32, i32) {
    %c0_i32 = arith.constant 0 : i32
    %c0_i32_0 = arith.constant 0 : i32
    return %c0_i32, %arg1 : i32, i32
  }
  func.func @transform_3(%arg0: i32, %arg1: i32, %arg2: i32) -> (i32, i32) {
    %c0_i32 = arith.constant 0 : i32
    return %arg0, %arg1 : i32, i32
  }
}

</mosaic_0001>

<bundles_post_ra>
// kernel: _lambda_.15
= control target key start
LH: loop header
LB: loop body
LE: loop exit
PB: predicated region body
PF: predicated region fallthrough
CT: control target
= control target key end

     0   :  { %vm19_vm0 = vcmask 785408   ;;  %v132_v0 = vmov 0.0   ;;  %vm133_vm1 = vmmov 0   ;;  %vm43_vm2 = vcmask 261120   ;;  %s181_s1 = inlined_call_operand.vmem [shape: bf16[32,96], index: 1, kind: input, shape index: {}]   ;;  %s182_s0 = inlined_call_operand.vmem [shape: f32[16,32], index: 0, kind: input, shape index: {}]   ;;  %s183_s2 = inlined_call_operand.vmem [shape: f32[1,96], index: 2, kind: input, shape index: {}]   ;;  %s184_s3 = inlined_call_operand.vmem [shape: f32[16,96], index: 3, kind: output, shape index: {}]  }
   0x1   :  { %120 = vmatprep.subr.bf16.mxu0 %v132_v0  ;;  %v130_v1 = vld [vmem:[%s181_s1] sm:$0xff]   ;;  %124 = vmatprep.mubr.msk.bf16.mxu0 %vm133_vm1, %v132_v0  ;;  %20 = vst.msk [vmem:[#allocation2] sm:$0xff] %vm19_vm0, %v132_v0  ;;  %21 = vst.msk [vmem:[#allocation2 + $0x8] sm:$0xff] %vm19_vm0, %v132_v0  ;;  %v131_v2 = vld [vmem:[%s181_s1 + $0x8] sm:$0xff]  }
   0x2   :  { %121 = vmatpush3.bf16.msra.mxu0 %v130_v1  ;;  %v22_v3 = vld [vmem:[%s182_s0] sm:$0xff]  ;;  %v23_v4 = vld [vmem:[%s182_s0 + $0x8] sm:$0xff] }
   0x3   :  { %122 = vmatprep.subr.bf16.mxu0 %v132_v0  ;;  %v24_v5 = vpack.c.bf16 %v23_v4, %v22_v3  ;;  %v116_v14 = vld [vmem:[%s183_s2] ss:$0 sm:$0xff] }
   0x6   :  { %123 = vmatpush3.bf16.msra.mxu0 %v131_v2 }
   0x8   :  { %v29_v6 = vld [vmem:[#allocation2] sm:$0xff]  ;;  %v30_v8 = vld [vmem:[#allocation2 + $0x8] sm:$0xff] }
   0x9   :  { %125 = vmatmul.mubr.msk.bf16.vlgmr.msra.gmra.mrb[0].mxu0 %vm43_vm2, %v24_v5 }
  0xdc   :  { %v81_v7 = vpop.f32.mrb[0].mxu0 }
  0xdd   :  { %v88_v9 = vadd.f32 %v81_v7, %v29_v6  ;;  %v126_v10 = vpop.f32.mrb[1].mxu0 }
  0xde   :  { %v84_v11 = vpop.f32.mrb[2].mxu0 }
  0xdf   :  { %91 = vst.msk [vmem:[#allocation2] sm:$0xff] %vm19_vm0, %v88_v9  ;;  %v89_v12 = vadd.f32 %v84_v11, %v30_v8  ;;  %v127_v13 = vpop.f32.mrb[3].mxu0 }
  0xe1   :  { %92 = vst.msk [vmem:[#allocation2 + $0x8] sm:$0xff] %vm19_vm0, %v89_v12 }
  0xe6   :  { %v96_v15 = vld [vmem:[#allocation2] sm:$0xff] }
  0xe7   :  { %v105_v16 = vadd.f32 %v116_v14, %v96_v15 }
  0xe8   :  { %v97_v17 = vld [vmem:[#allocation2 + $0x8] sm:$0xff] }
  0xe9   :  { %107 = vst.msk [vmem:[%s184_s3] sm:$0xff] %vm19_vm0, %v105_v16  ;;  %v106_v18 = vadd.f32 %v116_v14, %v97_v17 }
  0xeb   :  { %108 = vst.msk [vmem:[%s184_s3 + $0x8] sm:$0xff] %vm19_vm0, %v106_v18 }

// kernel: _lambda_.14
= control target key start
LH: loop header
LB: loop body
LE: loop exit
PB: predicated region body
PF: predicated region fallthrough
CT: control target
= control target key end

     0   :  { %vm16_vm0 = vcmask 261120   ;;  %s118_s0 = inlined_call_operand.vmem [shape: f32[16,32], index: 0, kind: input, shape index: {}]   ;;  %s119_s1 = inlined_call_operand.vmem [shape: f32[1,32], index: 1, kind: input, shape index: {}]   ;;  %s120_s2 = inlined_call_operand.vmem [shape: f32[1,32], index: 2, kind: input, shape index: {}]   ;;  %s121_s3 = inlined_call_operand.vmem [shape: f32[16,32], index: 3, kind: output, shape index: {}]  }
   0x1   :  { %v14_v0 = vld [vmem:[%s118_s0] sm:$0xff]  ;;  %v15_v1 = vld [vmem:[%s118_s0 + $0x8] sm:$0xff] }
   0x2   :  { %v17_v2 = vsel %vm16_vm0, %v14_v0, 0.0  ;;  %v20_v3 = vsel %vm16_vm0, %v15_v1, 0.0  ;;  %v68_v21 = vld [vmem:[%s119_s1] ss:$0 sm:$0xff] }
   0x3   :  { %18 = vadd.xlane.f32.xlu0 %v17_v2  ;;  %v69_v23 = vld [vmem:[%s120_s2] ss:$0 sm:$0xff] }
   0x7   :  { %21 = vadd.xlane.f32.xlu0 %v20_v3 }
  0x90   :  { %v19_v4 = vpop.xlane.xlu0 %18 }
  0x91   :  { %v24_v5 = vmul.f32 0.03125, %v19_v4 }
  0x93   :  { %v26_v6 = vsub.f32 %v14_v0, %v24_v5 }
  0x94   :  { %v22_v7 = vpop.xlane.xlu0 %21 }
  0x95   :  { %v25_v8 = vmul.f32 0.03125, %v22_v7  ;;  %v28_v9 = vmul.f32 %v26_v6, %v26_v6 }
  0x97   :  { %v27_v10 = vsub.f32 %v15_v1, %v25_v8  ;;  %v30_v11 = vsel %vm16_vm0, %v28_v9, 0.0 }
  0x98   :  { %31 = vadd.xlane.f32.xlu1 %v30_v11 }
  0x99   :  { %v29_v12 = vmul.f32 %v27_v10, %v27_v10 }
  0x9b   :  { %v33_v13 = vsel %vm16_vm0, %v29_v12, 0.0 }
  0x9c   :  { %34 = vadd.xlane.f32.xlu1 %v33_v13 }
 0x125   :  { %v32_v14 = vpop.xlane.xlu1 %31 }
 0x126   :  { %v36_v15 = vmul.f32 0.03125, %v32_v14 }
 0x128   :  { %v38_v16 = vadd.f32 1e-05, %v36_v15 }
 0x129   :  { %v35_v17 = vpop.xlane.xlu1 %34 }
 0x12a   :  { %70 = vrsqrt.f32 %v38_v16  ;;  %v37_v18 = vmul.f32 0.03125, %v35_v17 }
 0x12c   :  { %v39_v19 = vadd.f32 1e-05, %v37_v18 }
 0x12e   :  { %72 = vrsqrt.f32 %v39_v19 }
 0x134   :  { %v71_v20 = vpop.eup %70 }
 0x135   :  { %v42_v22 = vmul.f32 %v71_v20, %v26_v6 }
 0x137   :  { %v51_v24 = vmul.f32 %v68_v21, %v42_v22 }
 0x138   :  { %v73_v25 = vpop.eup %72 }
 0x139   :  { %v60_v26 = vadd.f32 %v69_v23, %v51_v24  ;;  %v43_v27 = vmul.f32 %v73_v25, %v27_v10 }
 0x13b   :  { %62 = vst.msk [vmem:[%s121_s3] sm:$0xff] %vm16_vm0, %v60_v26  ;;  %v52_v28 = vmul.f32 %v68_v21, %v43_v27 }
 0x13d   :  { %v61_v29 = vadd.f32 %v69_v23, %v52_v28 }
 0x13f   :  { %63 = vst.msk [vmem:[%s121_s3 + $0x8] sm:$0xff] %vm16_vm0, %v61_v29 }

// kernel: _lambda_.16
= control target key start
LH: loop header
LB: loop body
LE: loop exit
PB: predicated region body
PF: predicated region fallthrough
CT: control target
= control target key end

     0   :  { %s657_s12 = smov 0   ;;  %s659_s13 = smov 0   ;;  %s714_s0 = inlined_call_operand.vmem [shape: f32[8,8,8], index: 0, kind: input, shape index: {}]   ;;  %s715_s1 = inlined_call_operand.vmem [shape: f32[8,8,8], index: 1, kind: input, shape index: {}]   ;;  %s716_s2 = inlined_call_operand.vmem [shape: f32[8,8,8], index: 2, kind: input, shape index: {}]   ;;  %s717_s3 = inlined_call_operand.vmem [shape: f32[8,8,8], index: 3, kind: output, shape index: {}]  }
   0x1   :  { %s661_s14 = smov 0  }
   0x2 LB: > { %s32_s15 = sadd.s32 1, %s627_s13  ;;  %p548_p0 = scmp.ge.s32.totalorder %s631_s14, 1  ;;  %s631_s14 = sphi %s661_s14, %s13_s14   ;;  %s627_s13 = sphi %s659_s13, %s719_s13   ;;  %s623_s12 = sphi %s657_s12, %s718_s12  }
   0x3   : > { %p34_p1 = scmp.ge.s32.totalorder %s32_s15, 8  ;;  %p190_p2 = scmp.lt.s32.totalorder %s631_s14, 9 }
   0x5   : > { %s721_s15 = smov (%p34_p1, %s32_s15), 0  ;;  %p191_p3 = pnand %p548_p0, %p190_p2 }
   0x6   : > { %p232_p4 = scmp.lt.s32.totalorder (!%p191_p3), %s623_s12, 7  ;;  %vm270_vm0 = vcmask (!%p191_p3), 64512   ;;  %v633_v0 = vmov (!%p191_p3), 0.0   ;;  %vm634_vm1 = vmmov (!%p191_p3), 0   ;;  %vm267_vm2 = vcmask (!%p191_p3), 7168  }
   0x7   : > { %194 = sbr.rel (%p191_p3) target bundleno = 824 (0x338), region = 32  ;;  %561 = vmatprep.subr.bf16.mxu0 (!%p191_p3), %v633_v0  ;;  %271 = vst.msk [vmem:[#allocation4] sm:$0xff] (!%p191_p3), %vm270_vm0, %v633_v0  ;;  %563 = vmatprep.mubr.msk.bf16.mxu0 (!%p191_p3), %vm634_vm1, %v633_v0  ;;  %v635_v7 = vmov (!%p191_p3), -inf   ;;  %v329_v8 = vlaneseq (!%p191_p3)  ;;  %v636_v17 = vmov (!%p191_p3), 0   ;;  %vm376_vm4 = vcmask (!%p191_p3), 1043456  }
   0x8   : > { %567 = vmatprep.subr.bf16.mxu1 (!%p191_p3), %v633_v0  ;;  %569 = vmatprep.mubr.msk.bf16.mxu1 (!%p191_p3), %vm634_vm1, %v633_v0  ;;  %268 = vst.msk [vmem:[#allocation2] sm:$0xff] (!%p191_p3), %vm267_vm2, %v635_v7  ;;  %269 = vst.msk [vmem:[#allocation3] sm:$0xff] (!%p191_p3), %vm267_vm2, %v633_v0 }
   0x9   : > { %v330_v9 = vshrl.u32 (!%p191_p3), %v329_v8, 7  ;;  %v334_v10 = vand.u32 (!%p191_p3), 127, %v329_v8  ;;  %601 = vset.pattern.permute.xlu0 (!%p191_p3), %v636_v17  ;;  %602 = vset.pattern.permute.xlu1 (!%p191_p3), %v636_v17 }
   0xb   : > { %vm337_vm3 = vcmp.ge.s32.totalorder (!%p191_p3), %v330_v9, %v334_v10 }
   0xe   : > { %s723_s12 = smov (!%p232_p4, %s623_s12), 7  ;;  %v363_v39 = vld [vmem:[#allocation4] sm:$0xff] }
   0xf   : > { %s676_s16 = sshll.u32 %s723_s12, 3  ;;  %v339_v18 = vld [vmem:[#allocation2] sm:$0xff]  ;;  %v355_v33 = vld [vmem:[#allocation3] sm:$0xff] }
  0x10   : > { %s245_s19 = scalar_lea.vmem %s715_s1, %s676_s16  ;;  %s238_s22 = scalar_lea.vmem %s714_s0, %s676_s16 }
  0x11   : > { %v280_v1 = vld [vmem:[%s245_s19] sm:$0xff]  ;;  %s252_s25 = scalar_lea.vmem %s716_s2, %s676_s16  ;;  %s259_s28 = scalar_lea.vmem %s717_s3, %s676_s16 }
  0x12   : > { %v277_v2 = vld [vmem:[%s238_s22] sm:$0xff]  ;;  %v281_v3 = vpack.c.bf16 %v280_v1, %v280_v1 }
  0x13   : > { %v278_v5 = vmul.f32 0.35355338, %v277_v2  ;;  %v371_v22 = vld [vmem:[%s252_s25] sm:$0xff] }
  0x14   : > { %v287_v4 = vsel %vm270_vm0, %v281_v3, 0  ;;  %v372_v23 = vpack.c.bf16 %v371_v22, %v371_v22 }
  0x15   : > { %562 = vmatpush3.bf16.xpose.msra.mxu0 %v287_v4  ;;  %v279_v6 = vpack.c.bf16 %v278_v5, %v278_v5 }
  0x16   : > { %v378_v24 = vsel %vm376_vm4, %v372_v23, 0 }
  0x17   : > { %568 = vmatpush3.bf16.msra.mxu1 %v378_v24 }
  0x1c   : > { %564 = vmatmul.mubr.msk.bf16.vlgmr.msra.gmra.mrb[0].mxu0 %vm270_vm0, %v279_v6 }
  0xef   : > { %v323_v11 = vpop.f32.mrb[0].mxu0 }
  0xf0   : > { %v338_v12 = vsel %vm337_vm3, %v323_v11, -1e+09  ;;  %v565_v13 = vpop.f32.mrb[1].mxu0 }
  0xf1   : > { %v326_v14 = vpop.f32.mrb[2].mxu0  ;;  %v340_v15 = vsel %vm270_vm0, %v338_v12, -inf }
  0xf2   : > { %341 = vmax.xlane.f32.xlu0 %v340_v15  ;;  %v566_v16 = vpop.f32.mrb[3].mxu0 }
 0x17f   : > { %v342_v19 = vpop.xlane.xlu0 %341 }
 0x180   : > { %v343_v20 = vmax.f32 %v339_v18, %v342_v19 }
 0x182   : > { %v344_v21 = vsub.f32 %v339_v18, %v343_v20  ;;  %422 = vst.msk [vmem:[#allocation2] sm:$0xff] %vm267_vm2, %v343_v20  ;;  %349 = vperm.xlu0 %601, %v343_v20  }
 0x184   : > { %v345_v31 = vmul.f32 1.442695, %v344_v21 }
 0x201   : > { %v350_v25 = vpop.permute.xlu0 %349 }
 0x202   : > { %v352_v26 = vsub.f32 %v338_v12, %v350_v25 }
 0x204   : > { %v353_v27 = vmul.f32 1.442695, %v352_v26 }
 0x206   : > { %603 = vpow2.f32 %v353_v27 }
 0x207   : > { %605 = vpow2.f32 %v345_v31 }
 0x210   : > { %v604_v28 = vpop.eup %603 }
 0x211   : > { %v357_v29 = vsel %vm270_vm0, %v604_v28, 0.0  ;;  %v370_v30 = vpack.c.bf16 %v604_v28, %v604_v28  ;;  %v606_v32 = vpop.eup %605 }
 0x212   : > { %358 = vadd.xlane.f32.xlu1 %v357_v29  ;;  %v356_v34 = vmul.f32 %v606_v32, %v355_v33 }
 0x213   : > { %570 = vmatmul.mubr.msk.bf16.vlgmr.msra.gmra.mrb[0].mxu1 %vm270_vm0, %v370_v30 }
 0x223   : > { %366 = vperm.xlu1 %602, %v606_v32  }
 0x29f   : > { %v359_v35 = vpop.xlane.xlu1 %358 }
 0x2a0   : > { %v360_v36 = vadd.f32 %v359_v35, %v356_v34 }
 0x2a2   : > { %362 = vst.msk [vmem:[#allocation3] sm:$0xff] %vm267_vm2, %v360_v36 }
 0x2a3   : > { %v367_v40 = vpop.permute.xlu1 %366 }
 0x2a4   : > { %v369_v41 = vmul.f32 %v367_v40, %v363_v39 }
 0x2a9   : > { %v427_v37 = vld [vmem:[#allocation3] sm:$0xff] }
 0x2aa   : > { %607 = vrcp.f32 %v427_v37 }
 0x2b4   : > { %v608_v38 = vpop.eup %607 }
 0x2b5   : > { %431 = vperm.xlu1 %602, %v608_v38  }
 0x2e6   : > { %v414_v42 = vpop.f32.mrb[0].mxu1 }
 0x2e7   : > { %v420_v43 = vadd.f32 %v414_v42, %v369_v41  ;;  %v571_v44 = vpop.f32.mrb[1].mxu1 }
 0x2e8   : > { %v417_v45 = vpop.f32.mrb[2].mxu1 }
 0x2e9   : > { %421 = vst.msk [vmem:[#allocation4] sm:$0xff] %vm270_vm0, %v420_v43  ;;  %v572_v46 = vpop.f32.mrb[3].mxu1 }
 0x2f0   : > { %v426_v47 = vld [vmem:[#allocation4] sm:$0xff] }
 0x334   : > { %v432_v48 = vpop.permute.xlu1 %431 }
 0x335   : > { %v434_v49 = vmul.f32 %v432_v48, %v426_v47 }
 0x337   : > { %436 = vst.msk [vmem:[%s259_s28] sm:$0xff] %vm270_vm0, %v434_v49 }
 0x338 PF: > { %s13_s14 = sadd.s32 1, %s631_s14   ;;  %s718_s12 = smov %s627_s13 }
 0x339   : > { %p10_p5 = scmp.ge.s32.totalorder %s13_s14, 10   ;;  %s719_s13 = smov %s721_s15 }
 0x33b   :  { %12 = sbr.rel (!%p10_p5) target bundleno = 2 (0x2), region = 80 }

// kernel: _lambda_.17
= control target key start
LH: loop header
LB: loop body
LE: loop exit
PB: predicated region body
PF: predicated region fallthrough
CT: control target
= control target key end

     0   :  { %vm19_vm0 = vcmask 261120   ;;  %v131_v0 = vmov 0.0   ;;  %vm132_vm1 = vmmov 0   ;;  %s181_s1 = inlined_call_operand.vmem [shape: bf16[32,32], index: 1, kind: input, shape index: {}]   ;;  %s182_s0 = inlined_call_operand.vmem [shape: f32[16,32], index: 0, kind: input, shape index: {}]   ;;  %s183_s2 = inlined_call_operand.vmem [shape: f32[1,32], index: 2, kind: input, shape index: {}]   ;;  %s184_s3 = inlined_call_operand.vmem [shape: f32[16,32], index: 3, kind: output, shape index: {}]  }
   0x1   :  { %119 = vmatprep.subr.bf16.mxu0 %v131_v0  ;;  %v129_v1 = vld [vmem:[%s181_s1] sm:$0xff]   ;;  %123 = vmatprep.mubr.msk.bf16.mxu0 %vm132_vm1, %v131_v0  ;;  %20 = vst.msk [vmem:[#allocation2] sm:$0xff] %vm19_vm0, %v131_v0  ;;  %21 = vst.msk [vmem:[#allocation2 + $0x8] sm:$0xff] %vm19_vm0, %v131_v0  ;;  %v130_v2 = vld [vmem:[%s181_s1 + $0x8] sm:$0xff]  }
   0x2   :  { %120 = vmatpush3.bf16.msra.mxu0 %v129_v1  ;;  %v22_v3 = vld [vmem:[%s182_s0] sm:$0xff]  ;;  %v23_v4 = vld [vmem:[%s182_s0 + $0x8] sm:$0xff] }
   0x3   :  { %121 = vmatprep.subr.bf16.mxu0 %v131_v0  ;;  %v24_v5 = vpack.c.bf16 %v23_v4, %v22_v3  ;;  %v115_v14 = vld [vmem:[%s183_s2] ss:$0 sm:$0xff] }
   0x6   :  { %122 = vmatpush3.bf16.msra.mxu0 %v130_v2 }
   0x8   :  { %v29_v6 = vld [vmem:[#allocation2] sm:$0xff]  ;;  %v30_v8 = vld [vmem:[#allocation2 + $0x8] sm:$0xff] }
   0x9   :  { %124 = vmatmul.mubr.msk.bf16.vlgmr.msra.gmra.mrb[0].mxu0 %vm19_vm0, %v24_v5 }
  0xdc   :  { %v81_v7 = vpop.f32.mrb[0].mxu0 }
  0xdd   :  { %v88_v9 = vadd.f32 %v81_v7, %v29_v6  ;;  %v125_v10 = vpop.f32.mrb[1].mxu0 }
  0xde   :  { %v84_v11 = vpop.f32.mrb[2].mxu0 }
  0xdf   :  { %90 = vst.msk [vmem:[#allocation2] sm:$0xff] %vm19_vm0, %v88_v9  ;;  %v89_v12 = vadd.f32 %v84_v11, %v30_v8  ;;  %v126_v13 = vpop.f32.mrb[3].mxu0 }
  0xe1   :  { %91 = vst.msk [vmem:[#allocation2 + $0x8] sm:$0xff] %vm19_vm0, %v89_v12 }
  0xe6   :  { %v95_v15 = vld [vmem:[#allocation2] sm:$0xff] }
  0xe7   :  { %v104_v16 = vadd.f32 %v115_v14, %v95_v15 }
  0xe8   :  { %v96_v17 = vld [vmem:[#allocation2 + $0x8] sm:$0xff] }
  0xe9   :  { %106 = vst.msk [vmem:[%s184_s3] sm:$0xff] %vm19_vm0, %v104_v16  ;;  %v105_v18 = vadd.f32 %v115_v14, %v96_v17 }
  0xeb   :  { %107 = vst.msk [vmem:[%s184_s3 + $0x8] sm:$0xff] %vm19_vm0, %v105_v18 }

// kernel: _lambda_.19
= control target key start
LH: loop header
LB: loop body
LE: loop exit
PB: predicated region body
PF: predicated region fallthrough
CT: control target
= control target key end

     0   :  { %vm25_vm0 = vcmask 261120   ;;  %v298_v0 = vmov 0.0   ;;  %vm299_vm1 = vmmov 0   ;;  %s385_s1 = inlined_call_operand.vmem [shape: bf16[32,128], index: 1, kind: input, shape index: {}]   ;;  %s386_s0 = inlined_call_operand.vmem [shape: f32[16,32], index: 0, kind: input, shape index: {}]   ;;  %s387_s3 = inlined_call_operand.vmem [shape: bf16[128,32], index: 3, kind: input, shape index: {}]   ;;  %s388_s2 = inlined_call_operand.vmem [shape: f32[1,128], index: 2, kind: input, shape index: {}]   ;;  %s389_s4 = inlined_call_operand.vmem [shape: f32[1,32], index: 4, kind: input, shape index: {}]   ;;  %s390_s5 = inlined_call_operand.vmem [shape: f32[16,32], index: 5, kind: output, shape index: {}]  }
   0x1   :  { %258 = vmatprep.subr.bf16.mxu0 %v298_v0  ;;  %v288_v1 = vld [vmem:[%s385_s1] sm:$0xff]   ;;  %262 = vmatprep.mubr.msk.bf16.mxu0 %vm299_vm1, %v298_v0  ;;  %26 = vst.msk [vmem:[#allocation2] sm:$0xff] %vm25_vm0, %v298_v0  ;;  %27 = vst.msk [vmem:[#allocation2 + $0x8] sm:$0xff] %vm25_vm0, %v298_v0  ;;  %v289_v2 = vld [vmem:[%s385_s1 + $0x8] sm:$0xff]  }
   0x2   :  { %266 = vmatprep.subr.bf16.mxu1 %v298_v0  ;;  %282 = vmatprep.mubr.msk.bf16.mxu1 %vm299_vm1, %v298_v0  ;;  %v28_v3 = vld [vmem:[%s386_s0] sm:$0xff]  ;;  %v29_v4 = vld [vmem:[%s386_s0 + $0x8] sm:$0xff]  ;;  %v292_v8 = vld [vmem:[%s387_s3 + $0x10] sm:$0xff]  }
   0x3   :  { %259 = vmatpush3.bf16.msra.mxu0 %v288_v1  ;;  %v290_v5 = vld [vmem:[%s387_s3] sm:$0xff]   ;;  %v30_v6 = vpack.c.bf16 %v29_v4, %v28_v3  ;;  %v291_v7 = vld [vmem:[%s387_s3 + $0x8] sm:$0xff]   ;;  %v293_v9 = vld [vmem:[%s387_s3 + $0x18] sm:$0xff]  }
   0x4   :  { %260 = vmatprep.subr.bf16.mxu0 %v298_v0  ;;  %267 = vmatpush3.bf16.msra.mxu1 %v290_v5  ;;  %v294_v10 = vld [vmem:[%s387_s3 + $0x20] sm:$0xff]   ;;  %v295_v11 = vld [vmem:[%s387_s3 + $0x28] sm:$0xff]   ;;  %v296_v12 = vld [vmem:[%s387_s3 + $0x30] sm:$0xff]  }
   0x5   :  { %268 = vmatprep.subr.bf16.mxu1 %v298_v0  ;;  %v297_v13 = vld [vmem:[%s387_s3 + $0x38] sm:$0xff]   ;;  %v233_v14 = vld [vmem:[%s388_s2] ss:$0 sm:$0xff] }
   0x6   :  { %v245_v32 = vld [vmem:[%s389_s4] ss:$0 sm:$0xff] }
   0x7   :  { %261 = vmatpush3.bf16.msra.mxu0 %v289_v2 }
   0x8   :  { %269 = vmatpush3.bf16.msra.mxu1 %v291_v7  ;;  %v101_v24 = vld [vmem:[#allocation2] sm:$0xff]  ;;  %v102_v26 = vld [vmem:[#allocation2 + $0x8] sm:$0xff] }
   0x9   :  { %270 = vmatprep.subr.bf16.mxu1 %v298_v0 }
   0xa   :  { %263 = vmatmul.mubr.msk.bf16.vlgmr.msra.gmra.mrb[0].mxu0 %vm25_vm0, %v30_v6 }
   0xc   :  { %271 = vmatpush3.bf16.msra.mxu1 %v292_v8 }
   0xd   :  { %272 = vmatprep.subr.bf16.mxu1 %v298_v0 }
  0x10   :  { %273 = vmatpush3.bf16.msra.mxu1 %v293_v9 }
  0x11   :  { %274 = vmatprep.subr.bf16.mxu1 %v298_v0 }
  0x14   :  { %275 = vmatpush3.bf16.msra.mxu1 %v294_v10 }
  0x15   :  { %276 = vmatprep.subr.bf16.mxu1 %v298_v0 }
  0x18   :  { %277 = vmatpush3.bf16.msra.mxu1 %v295_v11 }
  0x19   :  { %278 = vmatprep.subr.bf16.mxu1 %v298_v0 }
  0x1c   :  { %279 = vmatpush3.bf16.msra.mxu1 %v296_v12 }
  0x1d   :  { %280 = vmatprep.subr.bf16.mxu1 %v298_v0 }
  0x20   :  { %281 = vmatpush3.bf16.msra.mxu1 %v297_v13 }
  0xdd   :  { %v92_v15 = vpop.f32.mrb[0].mxu0 }
  0xde   :  { %v93_v16 = vadd.f32 %v233_v14, %v92_v15  ;;  %v264_v17 = vpop.f32.mrb[1].mxu0 }
  0xdf   :  { %v95_v18 = vpop.f32.mrb[2].mxu0 }
  0xe0   :  { %v96_v19 = vadd.f32 %v233_v14, %v95_v18  ;;  %v265_v20 = vpop.f32.mrb[3].mxu0  ;;  %v99_v21 = vmax.f32 %v93_v16, 0.0 }
  0xe2   :  { %v100_v22 = vmax.f32 %v96_v19, 0.0 }
  0xe4   :  { %v103_v23 = vpack.c.bf16 %v100_v22, %v99_v21 }
  0xe6   :  { %283 = vmatmul.mubr.bf16.vlgmr.msra.gmra.mrb[0].mxu1 %v103_v23 }
 0x1b9   :  { %v202_v25 = vpop.f32.mrb[0].mxu1 }
 0x1ba   :  { %v209_v27 = vadd.f32 %v202_v25, %v101_v24  ;;  %v284_v28 = vpop.f32.mrb[1].mxu1 }
 0x1bb   :  { %v205_v29 = vpop.f32.mrb[2].mxu1 }
 0x1bc   :  { %211 = vst.msk [vmem:[#allocation2] sm:$0xff] %vm25_vm0, %v209_v27  ;;  %v210_v30 = vadd.f32 %v205_v29, %v102_v26  ;;  %v285_v31 = vpop.f32.mrb[3].mxu1 }
 0x1be   :  { %212 = vst.msk [vmem:[#allocation2 + $0x8] sm:$0xff] %vm25_vm0, %v210_v30 }
 0x1c3   :  { %v216_v33 = vld [vmem:[#allocation2] sm:$0xff] }
 0x1c4   :  { %v225_v34 = vadd.f32 %v245_v32, %v216_v33 }
 0x1c5   :  { %v217_v35 = vld [vmem:[#allocation2 + $0x8] sm:$0xff] }
 0x1c6   :  { %227 = vst.msk [vmem:[%s390_s5] sm:$0xff] %vm25_vm0, %v225_v34  ;;  %v226_v36 = vadd.f32 %v245_v32, %v217_v35 }
 0x1c8   :  { %228 = vst.msk [vmem:[%s390_s5 + $0x8] sm:$0xff] %vm25_vm0, %v226_v36 }

// kernel: _lambda_.27
= control target key start
LH: loop header
LB: loop body
LE: loop exit
PB: predicated region body
PF: predicated region fallthrough
CT: control target
= control target key end

     0   :  { %v206_v1 = vmov 0.0   ;;  %vm56_vm0 = vcmask 261120   ;;  %vm20_vm1 = vcmask 523264   ;;  %vm207_vm2 = vmmov 0   ;;  %s275_s0 = inlined_call_operand.vmem [shape: f32[16,32], index: 0, kind: input, shape index: {}]   ;;  %s276_s1 = inlined_call_operand.vmem [shape: bf16[64,32], index: 1, kind: input, shape index: {}]   ;;  %s277_s2 = inlined_call_operand.vmem [shape: f32[1,64], index: 2, kind: input, shape index: {}]   ;;  %s278_s3 = inlined_call_operand.hbm [shape: f32[16,64], index: 3, kind: output, shape index: {}]  }
   0x1   :  { %v178_v0 = vld [vmem:[%s276_s1] sm:$0xff]   ;;  %161 = vmatprep.subr.bf16.mxu0 %v206_v1  ;;  %v179_v3 = vld [vmem:[%s276_s1 + $0x8] sm:$0xff]   ;;  %169 = vmatprep.mubr.msk.bf16.mxu0 %vm207_vm2, %v206_v1  ;;  %21 = vst.msk [vmem:[#allocation2] sm:$0xff] %vm20_vm1, %v206_v1  ;;  %22 = vst.msk [vmem:[#allocation2 + $0x8] sm:$0xff] %vm20_vm1, %v206_v1 }
   0x2   :  { %v61_v2 = vsel %vm56_vm0, %v178_v0, 0 }
   0x3   :  { %162 = vmatpush3.bf16.xpose.msra.mxu0 %v61_v2 }
   0x4   :  { %163 = vmatprep.subr.bf16.mxu0 %v206_v1 }
   0x5   :  { %8 = vsyncpa [#allocation4], 0  ;;  %v64_v4 = vsel %vm56_vm0, %v179_v3, 0  ;;  %v180_v5 = vld [vmem:[%s276_s1 + $0x10] sm:$0xff]   ;;  %v181_v7 = vld [vmem:[%s276_s1 + $0x18] sm:$0xff]  }
   0x6   :  { %v67_v6 = vsel %vm56_vm0, %v180_v5, 0  ;;  %v70_v8 = vsel %vm56_vm0, %v181_v7, 0  ;;  %v23_v9 = vld [vmem:[%s275_s0] sm:$0xff]  ;;  %v24_v10 = vld [vmem:[%s275_s0 + $0x8] sm:$0xff]  ;;  %s208_s0 = smov [#allocation3]  }
   0x7   :  { %v25_v11 = vpack.c.bf16 %v24_v10, %v23_v9  ;;  %v155_v20 = vld [vmem:[%s277_s2] ss:$0 sm:$0xff]  ;;  %s139_s25 = sshll.u32 %s208_s0, 4  ;;  %s140_s25 = int_to_ptr.vmem [resolvable:$true] %s139_s25 }
   0x8   :  { %v34_v12 = vld [vmem:[#allocation2] sm:$0xff]  ;;  %v35_v14 = vld [vmem:[#allocation2 + $0x8] sm:$0xff]  ;;  %s182_s26 = scalar_lea.vmem %s140_s25, 256  ;;  %p187_p1 = scmp.lt.s32.totalorder %s140_s25, %s140_s25 }
   0x9   :  { %p183_p0 = scmp.ne.s32.totalorder %s140_s25, %s182_s26  ;;  %p188_p2 = scmp.lt.s32.totalorder %s182_s26, %s182_s26 }
   0xb   :  { %164 = vmatpush3.bf16.xpose.msra.mxu0 %v64_v4  ;;  %p189_p3 = por %p188_p2, %p187_p1 }
   0xc   :  { %165 = vmatprep.subr.bf16.mxu0 %v206_v1 }
   0xd   :  { %p190_p4 = pnand %p189_p3, %p183_p0 }
  0x13   :  { %166 = vmatpush3.bf16.xpose.msra.mxu0 %v67_v6 }
  0x14   :  { %167 = vmatprep.subr.bf16.mxu0 %v206_v1 }
  0x1b   :  { %168 = vmatpush3.bf16.xpose.msra.mxu0 %v70_v8 }
  0x22   :  { %170 = vmatmul.mubr.msk.bf16.vlgmr.msra.gmra.mrb[0].mxu0 %vm56_vm0, %v25_v11 }
  0xf5   :  { %v106_v13 = vpop.f32.mrb[0].mxu0 }
  0xf6   :  { %v113_v15 = vadd.f32 %v106_v13, %v34_v12  ;;  %v171_v16 = vpop.f32.mrb[1].mxu0 }
  0xf7   :  { %v109_v17 = vpop.f32.mrb[2].mxu0 }
  0xf8   :  { %116 = vst.msk [vmem:[#allocation2] sm:$0xff] %vm20_vm1, %v113_v15  ;;  %v114_v18 = vadd.f32 %v109_v17, %v35_v14  ;;  %v172_v19 = vpop.f32.mrb[3].mxu0 }
  0xfa   :  { %117 = vst.msk [vmem:[#allocation2 + $0x8] sm:$0xff] %vm20_vm1, %v114_v18 }
  0xff   :  { %v121_v21 = vld [vmem:[#allocation2] sm:$0xff] }
 0x100   :  { %v130_v22 = vadd.f32 %v155_v20, %v121_v21 }
 0x101   :  { %v122_v23 = vld [vmem:[#allocation2 + $0x8] sm:$0xff] }
 0x102   :  { %v131_v24 = vadd.f32 %v155_v20, %v122_v23  ;;  %132 = vst.msk [vmem:[#allocation3] sm:$0xff] %vm20_vm1, %v130_v22 }
 0x104   :  { %133 = vst.msk [vmem:[#allocation3 + $0x8] sm:$0xff] %vm20_vm1, %v131_v24 }
 0x105   :  { %193 = shalt.err (!%p190_p4)
}
 0x106   :  { %s194_s28 = scalar_lea.hbm %s278_s3, 256 }
 0x107   :  { %p195_p5 = scmp.ne.s32.totalorder %s278_s3, %s194_s28  ;;  %p198_p6 = scmp.lt.u32.totalorder %s194_s28, %s278_s3 }
 0x109   :  { %p200_p7 = pnand %p198_p6, %p195_p5 }
 0x10b   :  { %203 = shalt.err (!%p200_p7)
}
 0x10c   :  { %s209_s6 = smov 128   ;;  %s210_s7 = smov 8  }
 0x10d   :  { %145 = dma.vmem_to_hbm [thread:$0]  %s140_s25, 256, %s278_s3, [#allocation4], %s209_s6, %s209_s6, %s210_s7  }
 0x10e   :  { %204 = dma.done.wait [#allocation4], 256  }
 0x10f   :  { %205 = vsyncadd [#allocation4], 4294967040 }
 0x110   :  { %149 = vsyncpa [#allocation4], 1 }

</bundles_post_ra>
